<compile_context>
chip_gen: v7x
topology: tpu7x:2x2x1
jax: 0.10.0
libtpu: 0.0.40
codegen_flags: <defaults>
</compile_context>

<pallas_src>
import jax
import jax.numpy as jnp
from jax.experimental import pallas as pl
from jax.experimental.pallas import tpu as pltpu


def _make_fused_double_conv_kernel(wrow, l_canvas, l_out, d1, d2):
    def kernel(x_ref, w1_ref, s1_ref, b1_ref, w2_ref, s2_ref, b2_ref,
               mask_ref, o_ref, canvas_ref):
        # x_ref:    (cin_pad, l_pad)   zero-padded, spatially flattened input slab
        # w1_ref:   (cout, 9*cin_pad)  conv1 weights, tap-major / channel-minor
        # w2_ref:   (cout, 9*cout)     conv2 weights
        # s*_ref:   (cout, 1)          folded BN scale
        # b*_ref:   (cout, 1)          folded BN bias (conv bias absorbed)
        # mask_ref: (1, l_canvas)      1.0 on conv1's valid HxW interior, else 0
        # o_ref:    (cout, l_out)      conv2 output in row-stride-WROW layout
        # canvas_ref: VMEM scratch (cout, l_canvas) = conv2's zero-padded input

        # ---- stage 1: 3x3 dilation-2 conv + BN + ReLU (one matmul) ----------
        taps1 = [x_ref[:, (d1 * ky) * wrow + d1 * kx:
                          (d1 * ky) * wrow + d1 * kx + l_canvas]
                 for ky in range(3) for kx in range(3)]
        im2col1 = jnp.concatenate(taps1, axis=0)              # (9*cin_pad, l_canvas)
        y1 = jnp.dot(w1_ref[...], im2col1,
                     preferred_element_type=jnp.float32)      # (cout, l_canvas)
        y1 = jnp.maximum(y1 * s1_ref[...] + b1_ref[...], 0.0)
        canvas_ref[...] = y1 * mask_ref[...]                  # zero the padding ring

        # ---- stage 2: 3x3 dilation-3 conv + BN + ReLU (one matmul) ----------
        taps2 = [canvas_ref[:, (d2 * ky) * wrow + d2 * kx:
                               (d2 * ky) * wrow + d2 * kx + l_out]
                 for ky in range(3) for kx in range(3)]
        im2col2 = jnp.concatenate(taps2, axis=0)              # (9*cout, l_out)
        y2 = jnp.dot(w2_ref[...], im2col2,
                     preferred_element_type=jnp.float32)      # (cout, l_out)
        o_ref[...] = jnp.maximum(y2 * s2_ref[...] + b2_ref[...], 0.0)

    return kernel


def up3_forward(params, x1, x2, x3, eps=1e-5):
    """Inputs/outputs are NCHW, exactly like the PyTorch module."""
    B = x1.shape[0]
    out_ch = params["w1"].shape[-1]
    in_ch = x1.shape[1] + x2.shape[1] + x3.shape[1]
    H, W = x2.shape[2], x2.shape[3]
    d1, d2 = 2, 3

    wrow = W + 2 * (d1 + d2)                       # shared flat row stride (26)
    l_out = H * wrow                               # conv2 extended output length (416)
    l_canvas = l_out + 2 * d2 * wrow + 2 * d2      # conv2 padded-input canvas (578)
    l_pad_min = l_canvas + 2 * d1 * wrow + 2 * d1  # conv1 padded-input reach  (686)
    h_pad = -(-l_pad_min // wrow)                  # padded rows (27)
    l_pad = h_pad * wrow                           # (702)
    cin_pad = -(-in_ch // 8) * 8                   # channels rounded to sublane mult (16)
    tp = d1 + d2                                   # total spatial pre-pad (5)

    # --- upsample + concat + pad + flatten (XLA fuses into one producer) -----
    x1u = jnp.repeat(jnp.repeat(x1, 2, axis=2), 2, axis=3)
    x = jnp.concatenate([x3, x2, x1u], axis=1)                         # (B, in_ch, H, W)
    xp = jnp.pad(x, ((0, 0), (0, cin_pad - in_ch),
                     (tp, h_pad - H - tp), (tp, tp)))                  # (B, cin_pad, h_pad, wrow)
    x_flat = xp.reshape(B, cin_pad, l_pad)

    # --- fold conv bias + BatchNorm (eval) into per-channel scale/bias -------
    s1 = params["bn1_gamma"] / jnp.sqrt(params["bn1_var"] + eps)
    b1 = params["bn1_beta"] + s1 * (params["b1"] - params["bn1_mean"])
    s2 = params["bn2_gamma"] / jnp.sqrt(params["bn2_var"] + eps)
    b2 = params["bn2_beta"] + s2 * (params["b2"] - params["bn2_mean"])

    # --- weights as (Cout, 9*Cin) matrices matching the im2col tap order -----
    w1p = jnp.pad(params["w1"], ((0, 0), (0, 0), (0, cin_pad - in_ch), (0, 0)))
    w1m = w1p.reshape(9 * cin_pad, out_ch).T                           # (out_ch, 9*cin_pad)
    w2m = params["w2"].reshape(9 * out_ch, out_ch).T                   # (out_ch, 9*out_ch)

    # --- mask: 1 on conv1's valid HxW interior of the canvas, 0 elsewhere ----
    idx = jnp.arange(l_canvas)
    rows, cols = idx // wrow, idx % wrow
    mask = ((rows >= d2) & (rows < d2 + H) &
            (cols >= d2) & (cols < d2 + W)).astype(jnp.float32).reshape(1, l_canvas)

    kernel = _make_fused_double_conv_kernel(wrow, l_canvas, l_out, d1, d2)
    y_ext = pl.pallas_call(
        kernel,
        out_shape=jax.ShapeDtypeStruct((B, out_ch, l_out), jnp.float32),
        grid=(B,),
        in_specs=[
            pl.BlockSpec((None, cin_pad, l_pad), lambda b: (b, 0, 0)),
            pl.BlockSpec((out_ch, 9 * cin_pad), lambda b: (0, 0)),
            pl.BlockSpec((out_ch, 1), lambda b: (0, 0)),
            pl.BlockSpec((out_ch, 1), lambda b: (0, 0)),
            pl.BlockSpec((out_ch, 9 * out_ch), lambda b: (0, 0)),
            pl.BlockSpec((out_ch, 1), lambda b: (0, 0)),
            pl.BlockSpec((out_ch, 1), lambda b: (0, 0)),
            pl.BlockSpec((1, l_canvas), lambda b: (0, 0)),
        ],
        out_specs=pl.BlockSpec((None, out_ch, l_out), lambda b: (b, 0, 0)),
        scratch_shapes=[pltpu.VMEM((out_ch, l_canvas), jnp.float32)],
        compiler_params=pltpu.CompilerParams(dimension_semantics=("parallel",)),
    )(x_flat, w1m, s1.reshape(out_ch, 1), b1.reshape(out_ch, 1),
      w2m, s2.reshape(out_ch, 1), b2.reshape(out_ch, 1), mask)

    # strip junk columns of the row-stride-WROW extended layout -> NCHW output
    return y_ext.reshape(B, out_ch, H, wrow)[:, :, :, :W]


def init_up3_params(key, in_ch, out_ch):
    ks = jax.random.split(key, 12)
    return {
        # conv weights stored in HWIO (== torch (Cout,Cin,kH,kW) transposed)
        "w1": 0.1 * jax.random.normal(ks[0], (3, 3, in_ch, out_ch), jnp.float32),
        "b1": 0.05 * jax.random.normal(ks[1], (out_ch,), jnp.float32),
        "w2": 0.1 * jax.random.normal(ks[2], (3, 3, out_ch, out_ch), jnp.float32),
        "b2": 0.05 * jax.random.normal(ks[3], (out_ch,), jnp.float32),
        "bn1_gamma": 1.0 + 0.1 * jax.random.normal(ks[4], (out_ch,), jnp.float32),
        "bn1_beta": 0.05 * jax.random.normal(ks[5], (out_ch,), jnp.float32),
        "bn1_mean": 0.05 * jax.random.normal(ks[6], (out_ch,), jnp.float32),
        "bn1_var": 1.0 + 0.1 * jnp.abs(jax.random.normal(ks[7], (out_ch,), jnp.float32)),
        "bn2_gamma": 1.0 + 0.1 * jax.random.normal(ks[8], (out_ch,), jnp.float32),
        "bn2_beta": 0.05 * jax.random.normal(ks[9], (out_ch,), jnp.float32),
        "bn2_mean": 0.05 * jax.random.normal(ks[10], (out_ch,), jnp.float32),
        "bn2_var": 1.0 + 0.1 * jnp.abs(jax.random.normal(ks[11], (out_ch,), jnp.float32)),
    }


if __name__ == "__main__":
    in_ch, out_ch = 12, 8           # cat channels: 4 (x3) + 4 (x2) + 4 (x1) = 12
    B, H, W = 2, 8, 8               # x1 spatial; x2/x3 are at 2H x 2W

    key = jax.random.PRNGKey(0)
    kp, k1, k2, k3 = jax.random.split(key, 4)
    params = init_up3_params(kp, in_ch, out_ch)

    x1 = jax.random.normal(k1, (B, 4, H, W), jnp.float32)
    x2 = jax.random.normal(k2, (B, 4, 2 * H, 2 * W), jnp.float32)
    x3 = jax.random.normal(k3, (B, 4, 2 * H, 2 * W), jnp.float32)

    fwd = jax.jit(up3_forward)
    out = jax.block_until_ready(fwd(params, x1, x2, x3))
    assert out.shape == (B, out_ch, 2 * H, 2 * W), out.shape
    print("KERNEL_OK")
</pallas_src>

<mosaic_0001>
module attributes {stable_mosaic.version = 11 : i64} {
  func.func @kernel(%arg0: i32, %arg1: memref<1x16x702xf32, #tpu.memory_space<vmem>>, %arg2: memref<8x144xf32, #tpu.memory_space<vmem>>, %arg3: memref<8x1xf32, #tpu.memory_space<vmem>>, %arg4: memref<8x1xf32, #tpu.memory_space<vmem>>, %arg5: memref<8x72xf32, #tpu.memory_space<vmem>>, %arg6: memref<8x1xf32, #tpu.memory_space<vmem>>, %arg7: memref<8x1xf32, #tpu.memory_space<vmem>>, %arg8: memref<1x578xf32, #tpu.memory_space<vmem>>, %arg9: memref<1x8x416xf32, #tpu.memory_space<vmem>>, %arg10: memref<8x578xf32, #tpu.memory_space<vmem>>) attributes {dimension_semantics = [#tpu.dimension_semantics<parallel>], iteration_bounds = array<i64: 2>, scalar_prefetch = 0 : i64, scratch_operands = 1 : i64, tpu.core_type = #tpu.core_type<tc>, window_params = [{transform_indices = @transform_0, window_bounds = array<i64: 1, 16, 702>}, {pipeline_mode = #tpu.pipeline_mode<synchronous>, transform_indices = @transform_1, window_bounds = array<i64: 8, 144>}, {pipeline_mode = #tpu.pipeline_mode<synchronous>, transform_indices = @transform_2, window_bounds = array<i64: 8, 1>}, {pipeline_mode = #tpu.pipeline_mode<synchronous>, transform_indices = @transform_3, window_bounds = array<i64: 8, 1>}, {pipeline_mode = #tpu.pipeline_mode<synchronous>, transform_indices = @transform_4, window_bounds = array<i64: 8, 72>}, {pipeline_mode = #tpu.pipeline_mode<synchronous>, transform_indices = @transform_5, window_bounds = array<i64: 8, 1>}, {pipeline_mode = #tpu.pipeline_mode<synchronous>, transform_indices = @transform_6, window_bounds = array<i64: 8, 1>}, {pipeline_mode = #tpu.pipeline_mode<synchronous>, transform_indices = @transform_7, window_bounds = array<i64: 1, 578>}, {transform_indices = @transform_8, window_bounds = array<i64: 1, 8, 416>}]} {
    %c0 = arith.constant 0 : index
    %c0_0 = arith.constant 0 : index
    %c0_1 = arith.constant 0 : index
    %0 = vector.load %arg1[%c0, %c0_0, %c0_1] : memref<1x16x702xf32, #tpu.memory_space<vmem>>, vector<1x16x578xf32>
    %1 = vector.shape_cast %0 : vector<1x16x578xf32> to vector<16x578xf32>
    %c0_2 = arith.constant 0 : index
    %c0_3 = arith.constant 0 : index
    %c2 = arith.constant 2 : index
    %2 = vector.load %arg1[%c0_2, %c0_3, %c2] : memref<1x16x702xf32, #tpu.memory_space<vmem>>, vector<1x16x578xf32>
    %3 = vector.shape_cast %2 : vector<1x16x578xf32> to vector<16x578xf32>
    %c0_4 = arith.constant 0 : index
    %c0_5 = arith.constant 0 : index
    %c4 = arith.constant 4 : index
    %4 = vector.load %arg1[%c0_4, %c0_5, %c4] : memref<1x16x702xf32, #tpu.memory_space<vmem>>, vector<1x16x578xf32>
    %5 = vector.shape_cast %4 : vector<1x16x578xf32> to vector<16x578xf32>
    %c0_6 = arith.constant 0 : index
    %c0_7 = arith.constant 0 : index
    %c52 = arith.constant 52 : index
    %6 = vector.load %arg1[%c0_6, %c0_7, %c52] : memref<1x16x702xf32, #tpu.memory_space<vmem>>, vector<1x16x578xf32>
    %7 = vector.shape_cast %6 : vector<1x16x578xf32> to vector<16x578xf32>
    %c0_8 = arith.constant 0 : index
    %c0_9 = arith.constant 0 : index
    %c54 = arith.constant 54 : index
    %8 = vector.load %arg1[%c0_8, %c0_9, %c54] : memref<1x16x702xf32, #tpu.memory_space<vmem>>, vector<1x16x578xf32>
    %9 = vector.shape_cast %8 : vector<1x16x578xf32> to vector<16x578xf32>
    %c0_10 = arith.constant 0 : index
    %c0_11 = arith.constant 0 : index
    %c56 = arith.constant 56 : index
    %10 = vector.load %arg1[%c0_10, %c0_11, %c56] : memref<1x16x702xf32, #tpu.memory_space<vmem>>, vector<1x16x578xf32>
    %11 = vector.shape_cast %10 : vector<1x16x578xf32> to vector<16x578xf32>
    %c0_12 = arith.constant 0 : index
    %c0_13 = arith.constant 0 : index
    %c104 = arith.constant 104 : index
    %12 = vector.load %arg1[%c0_12, %c0_13, %c104] : memref<1x16x702xf32, #tpu.memory_space<vmem>>, vector<1x16x578xf32>
    %13 = vector.shape_cast %12 : vector<1x16x578xf32> to vector<16x578xf32>
    %c0_14 = arith.constant 0 : index
    %c0_15 = arith.constant 0 : index
    %c106 = arith.constant 106 : index
    %14 = vector.load %arg1[%c0_14, %c0_15, %c106] : memref<1x16x702xf32, #tpu.memory_space<vmem>>, vector<1x16x578xf32>
    %15 = vector.shape_cast %14 : vector<1x16x578xf32> to vector<16x578xf32>
    %c0_16 = arith.constant 0 : index
    %c0_17 = arith.constant 0 : index
    %c108 = arith.constant 108 : index
    %16 = vector.load %arg1[%c0_16, %c0_17, %c108] : memref<1x16x702xf32, #tpu.memory_space<vmem>>, vector<1x16x578xf32>
    %17 = vector.shape_cast %16 : vector<1x16x578xf32> to vector<16x578xf32>
    %18 = tpu.concatenate %1, %3, %5, %7, %9, %11, %13, %15, %17 in 0 : vector<16x578xf32>, vector<16x578xf32>, vector<16x578xf32>, vector<16x578xf32>, vector<16x578xf32>, vector<16x578xf32>, vector<16x578xf32>, vector<16x578xf32>, vector<16x578xf32> -> vector<144x578xf32>
    %c0_18 = arith.constant 0 : index
    %c0_19 = arith.constant 0 : index
    %19 = vector.load %arg2[%c0_18, %c0_19] : memref<8x144xf32, #tpu.memory_space<vmem>>, vector<8x144xf32>
    %cst = arith.constant dense<0.000000e+00> : vector<8x578xf32>
    %20 = tpu.matmul %19, %18, %cst {dimension_numbers = #tpu.dot_dimension_numbers<[1], [0], [0], [1], [0, 0, 1, 1], [], []>} : vector<8x144xf32>, vector<144x578xf32>, vector<8x578xf32> -> vector<8x578xf32>
    %c0_20 = arith.constant 0 : index
    %c0_21 = arith.constant 0 : index
    %21 = vector.load %arg3[%c0_20, %c0_21] : memref<8x1xf32, #tpu.memory_space<vmem>>, vector<8x1xf32>
    %22 = vector.broadcast %21 : vector<8x1xf32> to vector<8x578xf32>
    %23 = arith.mulf %20, %22 : vector<8x578xf32>
    %c0_22 = arith.constant 0 : index
    %c0_23 = arith.constant 0 : index
    %24 = vector.load %arg4[%c0_22, %c0_23] : memref<8x1xf32, #tpu.memory_space<vmem>>, vector<8x1xf32>
    %25 = vector.broadcast %24 : vector<8x1xf32> to vector<8x578xf32>
    %26 = arith.addf %23, %25 : vector<8x578xf32>
    %cst_24 = arith.constant 0.000000e+00 : f32
    %27 = vector.broadcast %cst_24 : f32 to vector<8x578xf32>
    %28 = arith.maximumf %26, %27 : vector<8x578xf32>
    %c0_25 = arith.constant 0 : index
    %c0_26 = arith.constant 0 : index
    %29 = vector.load %arg8[%c0_25, %c0_26] : memref<1x578xf32, #tpu.memory_space<vmem>>, vector<1x578xf32>
    %30 = vector.broadcast %29 : vector<1x578xf32> to vector<8x578xf32>
    %31 = arith.mulf %28, %30 : vector<8x578xf32>
    %c0_27 = arith.constant 0 : index
    %c0_28 = arith.constant 0 : index
    %32 = vector.load %arg10[%c0_27, %c0_28] : memref<8x578xf32, #tpu.memory_space<vmem>>, vector<8x578xf32>
    tpu.vector_store %arg10[%c0_27, %c0_28], %31 {strides = array<i32>} : memref<8x578xf32, #tpu.memory_space<vmem>>, vector<8x578xf32>,
    %c0_29 = arith.constant 0 : index
    %c0_30 = arith.constant 0 : index
    %33 = vector.load %arg10[%c0_29, %c0_30] : memref<8x578xf32, #tpu.memory_space<vmem>>, vector<8x416xf32>
    %c0_31 = arith.constant 0 : index
    %c3 = arith.constant 3 : index
    %34 = vector.load %arg10[%c0_31, %c3] : memref<8x578xf32, #tpu.memory_space<vmem>>, vector<8x416xf32>
    %c0_32 = arith.constant 0 : index
    %c6 = arith.constant 6 : index
    %35 = vector.load %arg10[%c0_32, %c6] : memref<8x578xf32, #tpu.memory_space<vmem>>, vector<8x416xf32>
    %c0_33 = arith.constant 0 : index
    %c78 = arith.constant 78 : index
    %36 = vector.load %arg10[%c0_33, %c78] : memref<8x578xf32, #tpu.memory_space<vmem>>, vector<8x416xf32>
    %c0_34 = arith.constant 0 : index
    %c81 = arith.constant 81 : index
    %37 = vector.load %arg10[%c0_34, %c81] : memref<8x578xf32, #tpu.memory_space<vmem>>, vector<8x416xf32>
    %c0_35 = arith.constant 0 : index
    %c84 = arith.constant 84 : index
    %38 = vector.load %arg10[%c0_35, %c84] : memref<8x578xf32, #tpu.memory_space<vmem>>, vector<8x416xf32>
    %c0_36 = arith.constant 0 : index
    %c156 = arith.constant 156 : index
    %39 = vector.load %arg10[%c0_36, %c156] : memref<8x578xf32, #tpu.memory_space<vmem>>, vector<8x416xf32>
    %c0_37 = arith.constant 0 : index
    %c159 = arith.constant 159 : index
    %40 = vector.load %arg10[%c0_37, %c159] : memref<8x578xf32, #tpu.memory_space<vmem>>, vector<8x416xf32>
    %c0_38 = arith.constant 0 : index
    %c162 = arith.constant 162 : index
    %41 = vector.load %arg10[%c0_38, %c162] : memref<8x578xf32, #tpu.memory_space<vmem>>, vector<8x416xf32>
    %42 = tpu.concatenate %33, %34, %35, %36, %37, %38, %39, %40, %41 in 0 : vector<8x416xf32>, vector<8x416xf32>, vector<8x416xf32>, vector<8x416xf32>, vector<8x416xf32>, vector<8x416xf32>, vector<8x416xf32>, vector<8x416xf32>, vector<8x416xf32> -> vector<72x416xf32>
    %c0_39 = arith.constant 0 : index
    %c0_40 = arith.constant 0 : index
    %43 = vector.load %arg5[%c0_39, %c0_40] : memref<8x72xf32, #tpu.memory_space<vmem>>, vector<8x72xf32>
    %cst_41 = arith.constant dense<0.000000e+00> : vector<8x416xf32>
    %44 = tpu.matmul %43, %42, %cst_41 {dimension_numbers = #tpu.dot_dimension_numbers<[1], [0], [0], [1], [0, 0, 1, 1], [], []>} : vector<8x72xf32>, vector<72x416xf32>, vector<8x416xf32> -> vector<8x416xf32>
    %c0_42 = arith.constant 0 : index
    %c0_43 = arith.constant 0 : index
    %45 = vector.load %arg6[%c0_42, %c0_43] : memref<8x1xf32, #tpu.memory_space<vmem>>, vector<8x1xf32>
    %46 = vector.broadcast %45 : vector<8x1xf32> to vector<8x416xf32>
    %47 = arith.mulf %44, %46 : vector<8x416xf32>
    %c0_44 = arith.constant 0 : index
    %c0_45 = arith.constant 0 : index
    %48 = vector.load %arg7[%c0_44, %c0_45] : memref<8x1xf32, #tpu.memory_space<vmem>>, vector<8x1xf32>
    %49 = vector.broadcast %48 : vector<8x1xf32> to vector<8x416xf32>
    %50 = arith.addf %47, %49 : vector<8x416xf32>
    %cst_46 = arith.constant 0.000000e+00 : f32
    %51 = vector.broadcast %cst_46 : f32 to vector<8x416xf32>
    %52 = arith.maximumf %50, %51 : vector<8x416xf32>
    %c0_47 = arith.constant 0 : index
    %c0_48 = arith.constant 0 : index
    %c0_49 = arith.constant 0 : index
    %53 = vector.load %arg9[%c0_47, %c0_48, %c0_49] : memref<1x8x416xf32, #tpu.memory_space<vmem>>, vector<1x8x416xf32>
    %54 = vector.shape_cast %53 : vector<1x8x416xf32> to vector<8x416xf32>
    %55 = vector.shape_cast %52 : vector<8x416xf32> to vector<1x8x416xf32>
    tpu.vector_store %arg9[%c0_47, %c0_48, %c0_49], %55 {strides = array<i32>} : memref<1x8x416xf32, #tpu.memory_space<vmem>>, vector<1x8x416xf32>,
    return
  }
  func.func @transform_0(%arg0: i32) -> (i32, i32, i32) {
    %c0_i32 = arith.constant 0 : i32
    %c0_i32_0 = arith.constant 0 : i32
    %c0_i32_1 = arith.constant 0 : i32
    return %arg0, %c0_i32, %c0_i32_0 : i32, i32, i32
  }
  func.func @transform_1(%arg0: i32) -> (i32, i32) {
    %c0_i32 = arith.constant 0 : i32
    %c0_i32_0 = arith.constant 0 : i32
    %c0_i32_1 = arith.constant 0 : i32
    return %c0_i32, %c0_i32_0 : i32, i32
  }
  func.func @transform_2(%arg0: i32) -> (i32, i32) {
    %c0_i32 = arith.constant 0 : i32
    %c0_i32_0 = arith.constant 0 : i32
    %c0_i32_1 = arith.constant 0 : i32
    return %c0_i32, %c0_i32_0 : i32, i32
  }
  func.func @transform_3(%arg0: i32) -> (i32, i32) {
    %c0_i32 = arith.constant 0 : i32
    %c0_i32_0 = arith.constant 0 : i32
    %c0_i32_1 = arith.constant 0 : i32
    return %c0_i32, %c0_i32_0 : i32, i32
  }
  func.func @transform_4(%arg0: i32) -> (i32, i32) {
    %c0_i32 = arith.constant 0 : i32
    %c0_i32_0 = arith.constant 0 : i32
    %c0_i32_1 = arith.constant 0 : i32
    return %c0_i32, %c0_i32_0 : i32, i32
  }
  func.func @transform_5(%arg0: i32) -> (i32, i32) {
    %c0_i32 = arith.constant 0 : i32
    %c0_i32_0 = arith.constant 0 : i32
    %c0_i32_1 = arith.constant 0 : i32
    return %c0_i32, %c0_i32_0 : i32, i32
  }
  func.func @transform_6(%arg0: i32) -> (i32, i32) {
    %c0_i32 = arith.constant 0 : i32
    %c0_i32_0 = arith.constant 0 : i32
    %c0_i32_1 = arith.constant 0 : i32
    return %c0_i32, %c0_i32_0 : i32, i32
  }
  func.func @transform_7(%arg0: i32) -> (i32, i32) {
    %c0_i32 = arith.constant 0 : i32
    %c0_i32_0 = arith.constant 0 : i32
    %c0_i32_1 = arith.constant 0 : i32
    return %c0_i32, %c0_i32_0 : i32, i32
  }
  func.func @transform_8(%arg0: i32) -> (i32, i32, i32) {
    %c0_i32 = arith.constant 0 : i32
    %c0_i32_0 = arith.constant 0 : i32
    %c0_i32_1 = arith.constant 0 : i32
    return %arg0, %c0_i32, %c0_i32_0 : i32, i32, i32
  }
}

</mosaic_0001>

<bundles_post_ra>
// kernel: up3_forward.1
= control target key start
LH: loop header
LB: loop body
LE: loop exit
PB: predicated region body
PF: predicated region fallthrough
CT: control target
= control target key end

     0   :  { %s1810_s27 = smov 0   ;;  %s2184_s0 = inlined_call_operand.vmem [shape: f32[2,16,702], index: 0, kind: input, shape index: {}]   ;;  %s2185_s1 = inlined_call_operand.vmem [shape: f32[8,144], index: 1, kind: input, shape index: {}]   ;;  %s2186_s2 = inlined_call_operand.vmem [shape: f32[8,1], index: 2, kind: input, shape index: {}]   ;;  %s2187_s3 = inlined_call_operand.vmem [shape: f32[8,1], index: 3, kind: input, shape index: {}]   ;;  %s2188_s4 = inlined_call_operand.vmem [shape: f32[8,72], index: 4, kind: input, shape index: {}]   ;;  %s2189_s5 = inlined_call_operand.vmem [shape: f32[8,1], index: 5, kind: input, shape index: {}]   ;;  %s2190_s6 = inlined_call_operand.vmem [shape: f32[8,1], index: 6, kind: input, shape index: {}]   ;;  %s2191_s7 = inlined_call_operand.vmem [shape: f32[1,578], index: 7, kind: input, shape index: {}]   ;;  %s2192_s8 = inlined_call_operand.vmem [shape: f32[2,8,416], index: 8, kind: output, shape index: {}]  }
   0x1 LB: > { %s1311_s28 = sadd.s32 4294967295, %s1744_s27   ;;  %p1315_p0 = scmp.ge.s32.totalorder %s1744_s27, 1  ;;  %s1744_s27 = sphi %s1810_s27, %s18_s27  }
   0x2   : > { %p262_p1 = scmp.lt.s32.totalorder %s1744_s27, 3 }
   0x4   : > { %p263_p2 = pnand %p1315_p0, %p262_p1 }
   0x5   : > { %p296_p3 = scmp.lt.s32.totalorder (!%p263_p2), %s1311_s28, 1  ;;  %s1746_s11 = smov (!%p263_p2), 126   ;;  %v1854_v19 = vld [vmem:[%s2185_s1 + $0x8] sm:$0xff] (!%p263_p2)  ;;  %vm662_vm0 = vcmask (!%p263_p2), 130048   ;;  %v878_v23 = vld [vmem:[%s2186_s2] sm:$0xff] (!%p263_p2)  ;;  %v1754_v25 = vmov (!%p263_p2), 0  }
   0x6   : > { %266 = sbr.rel (%p263_p2) target bundleno = 827 (0x33b), region = 52  ;;  %s1747_s12 = smov (!%p263_p2), 124   ;;  %1319 = vmatprep.mubr.msk.f32.mxu0 (!%p263_p2), %vm662_vm0, %v1854_v19  ;;  %1320 = vmatprep.mubr.msk.f32.mxu1 (!%p263_p2), %vm662_vm0, %v1854_v19  ;;  %v889_v24 = vld [vmem:[%s2187_s3] sm:$0xff] (!%p263_p2)  ;;  %vm348_vm1 = vcmask (!%p263_p2), 1031168   ;;  %vm387_vm2 = vcmask (!%p263_p2), 1014784   ;;  %vm426_vm3 = vcmask (!%p263_p2), 621568  }
   0x7   : > { %s1748_s13 = smov (!%p263_p2), 76   ;;  %s1749_s14 = smov (!%p263_p2), 74   ;;  %1701 = vset.pattern.permute.xlu1 (!%p263_p2), %v1754_v25  ;;  %1702 = vset.pattern.permute.xlu0 (!%p263_p2), %v1754_v25  ;;  %vm465_vm4 = vcmask (!%p263_p2), 605184   ;;  %vm504_vm5 = vcmask (!%p263_p2), 588800   ;;  %vm549_vm6 = vcmask (!%p263_p2), 195584   ;;  %vm594_vm7 = vcmask (!%p263_p2), 179200  }
   0x8   : > { %s1750_s15 = smov (!%p263_p2), 72   ;;  %s1751_s16 = smov (!%p263_p2), 24   ;;  %vm639_vm8 = vcmask (!%p263_p2), 162816   ;;  %vm941_vm9 = vcmask (!%p263_p2), 539648   ;;  %vm960_vm10 = vcmask (!%p263_p2), 1022976   ;;  %vm976_vm11 = vcmask (!%p263_p2), 998400  }
   0x9   : > { %s1752_s17 = smov (!%p263_p2), 22   ;;  %s1753_s18 = smov (!%p263_p2), 20   ;;  %vm992_vm12 = vcmask (!%p263_p2), 408576   ;;  %vm1008_vm13 = vcmask (!%p263_p2), 384000   ;;  %vm1024_vm14 = vcmask (!%p263_p2), 359424   ;;  %vm1041_vm15 = vcmask (!%p263_p2), 818176  }
   0xa   : > { %s1756_s9 = smov (!%p263_p2), 122  }
   0xd   : > { %s2194_s28 = smov (!%p296_p3, %s1311_s28), 1 }
   0xe   : > { %s1458_s29 = smul.u32 96, %s2194_s28  ;;  %s1326_s23 = sshll.u32 %s2194_s28, 5 }
   0xf   : > { %s305_s26 = scalar_lea.vmem %s2192_s8, %s1326_s23 }
  0x10   : > { %s1824_s10 = scalar_lea.vmem %s2184_s0, %s1458_s29 }
  0x11   : > { %v307_v0 = vld [vmem:[%s1824_s10 + $0x8] sm:$0xff]  ;;  %v308_v1 = vld [vmem:[%s1824_s10 + $0x10] sm:$0xff]  ;;  %v306_v2 = vld [vmem:[%s1824_s10] sm:$0xff] }
  0x12   : > { %v1486_v3 = vpack.i.bf16 %v308_v1, %v307_v0  ;;  %v311_v4 = vld [vmem:[%s1824_s10 + $0x30] sm:$0xff]  ;;  %v312_v5 = vld [vmem:[%s1824_s10 + $0x38] sm:$0xff]  ;;  %v313_v6 = vld [vmem:[%s1824_s10 + $0x40] sm:$0xff] }
  0x13   : > { %v1832_v7 = vpack.i.bf16 %v311_v4, %v306_v2  ;;  %v1491_v8 = vpack.i.bf16 %v313_v6, %v312_v5  ;;  %v309_v9 = vld [vmem:[%s1824_s10 + $0x18] sm:$0xff]  ;;  %v1837_v10 = vld [vmem:[%s1824_s10 + $0x20] sm:$0xff]  ;;  %v314_v12 = vld [vmem:[%s1824_s10 + $0x48] sm:$0xff]  ;;  %v1327_v15 = vpack.c.bf16 %v312_v5, %v307_v0  ;;  %v1329_v16 = vpack.c.bf16 %v311_v4, %v306_v2 }
  0x14   : > { %1487 = vrot.lane.b32.xlu0 %v1486_v3, %s1746_s11  ;;  %v1511_v11 = vpack.i.bf16 %v1837_v10, %v309_v9  ;;  %v1842_v13 = vld [vmem:[%s1824_s10 + $0x50] sm:$0xff]  ;;  %v1363_v17 = vpack.c.bf16 %v314_v12, %v309_v9  ;;  %v1365_v18 = vpack.c.bf16 %v313_v6, %v308_v1  ;;  %v316_v20 = vld [vmem:[%s1824_s10 + $0x28] sm:$0xff]  ;;  %v317_v21 = vld [vmem:[%s1824_s10 + $0x58] sm:$0xff]  ;;  %s1757_s10 = smov 125  }
  0x15   : > { %1497 = vrot.lane.b32.xlu1 %v1832_v7, %s1746_s11  ;;  %v1516_v14 = vpack.i.bf16 %v1842_v13, %v314_v12  ;;  %1328 = vmatprep.subr.bf16.mxu0 %v1327_v15  ;;  %v1686_v22 = vpack.i.bf16 %v317_v21, %v316_v20 }
  0x16   : > { %1330 = vmatpush1.bf16.msra.mxu0 %v1329_v16  ;;  %1364 = vmatprep.subr.bf16.mxu1 %v1363_v17 }
  0x17   : > { %1366 = vmatpush1.bf16.msra.mxu1 %v1365_v18 }
  0x18   : > { %1492 = vrot.lane.b32.xlu0 %v1491_v8, %s1746_s11 }
  0x19   : > { %1502 = vrot.lane.b32.xlu1 %v1486_v3, %s1747_s12 }
  0x1c   : > { %1507 = vrot.lane.b32.xlu0 %v1491_v8, %s1747_s12 }
  0x1d   : > { %1512 = vrot.lane.b32.xlu1 %v1511_v11, %s1746_s11 }
  0x20   : > { %1517 = vrot.lane.b32.xlu0 %v1516_v14, %s1746_s11  ;;  %s1758_s11 = smov 47  }
  0x21   : > { %1522 = vrot.lane.b32.xlu1 %v1832_v7, %s1747_s12 }
  0x24   : > { %1527 = vrot.lane.b32.xlu0 %v1486_v3, %s1748_s13 }
  0x25   : > { %1532 = vrot.lane.b32.xlu1 %v1491_v8, %s1748_s13 }
  0x28   : > { %1537 = vrot.lane.b32.xlu0 %v1511_v11, %s1747_s12 }
  0x29   : > { %1542 = vrot.lane.b32.xlu1 %v1516_v14, %s1747_s12  ;;  %s1759_s12 = smov 50  }
  0x2c   : > { %1547 = vrot.lane.b32.xlu0 %v1832_v7, %s1748_s13 }
  0x2d   : > { %1552 = vrot.lane.b32.xlu1 %v1486_v3, %s1749_s14 }
  0x30   : > { %1557 = vrot.lane.b32.xlu0 %v1491_v8, %s1749_s14 }
  0x31   : > { %1562 = vrot.lane.b32.xlu1 %v1511_v11, %s1748_s13 }
  0x34   : > { %1567 = vrot.lane.b32.xlu0 %v1516_v14, %s1748_s13  ;;  %s1760_s13 = smov 44  }
  0x35   : > { %1572 = vrot.lane.b32.xlu1 %v1832_v7, %s1749_s14 }
  0x38   : > { %1577 = vrot.lane.b32.xlu0 %v1486_v3, %s1750_s15 }
  0x39   : > { %1582 = vrot.lane.b32.xlu1 %v1491_v8, %s1750_s15 }
  0x3c   : > { %1587 = vrot.lane.b32.xlu0 %v1511_v11, %s1749_s14 }
  0x3d   : > { %1592 = vrot.lane.b32.xlu1 %v1516_v14, %s1749_s14  ;;  %s1761_s14 = smov 100  }
  0x40   : > { %1597 = vrot.lane.b32.xlu0 %v1832_v7, %s1750_s15 }
  0x41   : > { %1602 = vrot.lane.b32.xlu1 %v1486_v3, %s1751_s16 }
  0x44   : > { %1607 = vrot.lane.b32.xlu0 %v1491_v8, %s1751_s16 }
  0x45   : > { %1612 = vrot.lane.b32.xlu1 %v1511_v11, %s1750_s15 }
  0x48   : > { %1617 = vrot.lane.b32.xlu0 %v1516_v14, %s1750_s15  ;;  %s1762_s15 = smov 94  }
  0x49   : > { %1622 = vrot.lane.b32.xlu1 %v1832_v7, %s1751_s16 }
  0x4c   : > { %1627 = vrot.lane.b32.xlu0 %v1486_v3, %s1752_s17 }
  0x4d   : > { %1632 = vrot.lane.b32.xlu1 %v1491_v8, %s1752_s17 }
  0x50   : > { %1637 = vrot.lane.b32.xlu0 %v1511_v11, %s1751_s16 }
  0x51   : > { %1642 = vrot.lane.b32.xlu1 %v1516_v14, %s1751_s16 }
  0x54   : > { %1647 = vrot.lane.b32.xlu0 %v1832_v7, %s1752_s17 }
  0x55   : > { %1652 = vrot.lane.b32.xlu1 %v1486_v3, %s1753_s18 }
  0x58   : > { %1657 = vrot.lane.b32.xlu0 %v1491_v8, %s1753_s18 }
  0x59   : > { %1662 = vrot.lane.b32.xlu1 %v1511_v11, %s1752_s17 }
  0x5c   : > { %1667 = vrot.lane.b32.xlu0 %v1516_v14, %s1752_s17 }
  0x5d   : > { %1672 = vrot.lane.b32.xlu1 %v1832_v7, %s1753_s18 }
  0x60   : > { %1677 = vrot.lane.b32.xlu0 %v1511_v11, %s1753_s18 }
  0x61   : > { %1682 = vrot.lane.b32.xlu1 %v1516_v14, %s1753_s18 }
  0x64   : > { %1687 = vrot.lane.b32.xlu0 %v1686_v22, %s1751_s16  ;;  %s1763_s16 = smov 97  }
  0x65   : > { %1692 = vrot.lane.b32.xlu1 %v1686_v22, %s1752_s17 }
  0x68   : > { %1697 = vrot.lane.b32.xlu0 %v1686_v22, %s1753_s18 }
  0x69   : > { %881 = vperm.xlu1 %1701, %v878_v23  }
  0x6c   : > { %892 = vperm.xlu0 %1702, %v889_v24  }
  0x86   : > { %v1488_v26 = vpop.permute.xlu0 %1487 }
  0x87   : > { %v1490_v27 = vunpack.i.h.bf16 %v1488_v26  ;;  %v1498_v28 = vpop.permute.xlu1 %1497  ;;  %v1489_v29 = vunpack.i.l.bf16 %v1488_v26 }
  0x88   : > { %v1499_v30 = vunpack.i.l.bf16 %v1498_v28  ;;  %v1500_v32 = vunpack.i.h.bf16 %v1498_v28 }
  0x89   : > { %v350_v36 = vsel %vm348_vm1, %v1489_v29, %v1490_v27 }
  0x8a   : > { %v1493_v31 = vpop.permute.xlu0 %1492  ;;  %v349_v37 = vsel %vm348_vm1, %v1499_v30, %v1489_v29 }
  0x8b   : > { %v1495_v33 = vunpack.i.h.bf16 %v1493_v31  ;;  %v1494_v34 = vunpack.i.l.bf16 %v1493_v31  ;;  %v1503_v35 = vpop.permute.xlu1 %1502 }
  0x8c   : > { %v1505_v38 = vunpack.i.h.bf16 %v1503_v35  ;;  %v1504_v39 = vunpack.i.l.bf16 %v1503_v35 }
  0x8d   : > { %v354_v40 = vsel %vm348_vm1, %v1494_v34, %v1495_v33  ;;  %v353_v41 = vsel %vm348_vm1, %v1500_v32, %v1494_v34 }
  0x8e   : > { %v1508_v42 = vpop.permute.xlu0 %1507  ;;  %v1331_v43 = vpack.c.bf16 %v354_v40, %v350_v36  ;;  %v1333_v44 = vpack.c.bf16 %v353_v41, %v349_v37  ;;  %v389_v50 = vsel %vm387_vm2, %v1504_v39, %v1505_v38 }
  0x8f   : > { %v1510_v45 = vunpack.i.h.bf16 %v1508_v42  ;;  %v1509_v46 = vunpack.i.l.bf16 %v1508_v42  ;;  %v1513_v47 = vpop.permute.xlu1 %1512 }
  0x90   : > { %v1515_v48 = vunpack.i.h.bf16 %v1513_v47  ;;  %v1514_v49 = vunpack.i.l.bf16 %v1513_v47  ;;  %1332 = vmatprep.subr.bf16.mxu0 %v1331_v43 }
  0x91   : > { %1334 = vmatpush1.bf16.msra.mxu0 %v1333_v44  ;;  %v393_v51 = vsel %vm387_vm2, %v1509_v46, %v1510_v45 }
  0x92   : > { %v1518_v52 = vpop.permute.xlu0 %1517  ;;  %v1335_v53 = vpack.c.bf16 %v393_v51, %v389_v50  ;;  %v352_v59 = vsel %vm348_vm1, %v1514_v49, %v1515_v48  ;;  %v351_v62 = vsel %vm348_vm1, %v1490_v27, %v1514_v49 }
  0x93   : > { %v1520_v54 = vunpack.i.h.bf16 %v1518_v52  ;;  %v1519_v55 = vunpack.i.l.bf16 %v1518_v52  ;;  %v1523_v56 = vpop.permute.xlu1 %1522 }
  0x94   : > { %v1525_v57 = vunpack.i.h.bf16 %v1523_v56  ;;  %v1524_v58 = vunpack.i.l.bf16 %v1523_v56  ;;  %1336 = vmatprep.subr.bf16.mxu0 %v1335_v53 }
  0x95   : > { %v1876_v60 = vpack.c.bf16 %v1520_v54, %v1515_v48  ;;  %v356_v61 = vsel %vm348_vm1, %v1519_v55, %v1520_v54  ;;  %v355_v63 = vsel %vm348_vm1, %v1495_v33, %v1519_v55  ;;  %vm1073_vm1 = vcmask 769024  }
  0x96   : > { %v1881_v0 = vpop.permute.xlu0 %1527  ;;  %v388_v1 = vsel %vm387_vm2, %v1524_v58, %v1504_v39  ;;  %v392_v2 = vsel %vm387_vm2, %v1525_v57, %v1509_v46  ;;  %v1367_v3 = vpack.c.bf16 %v356_v61, %v352_v59  ;;  %v1369_v4 = vpack.c.bf16 %v355_v63, %v351_v62 }
  0x97   : > { %v1530_v5 = vunpack.i.h.bf16 %v1881_v0  ;;  %v1529_v6 = vunpack.i.l.bf16 %v1881_v0  ;;  %v1533_v7 = vpop.permute.xlu1 %1532  ;;  %v1337_v8 = vpack.c.bf16 %v392_v2, %v388_v1 }
  0x98   : > { %v1535_v9 = vunpack.i.h.bf16 %v1533_v7  ;;  %v1534_v11 = vunpack.i.l.bf16 %v1533_v7  ;;  %1368 = vmatprep.subr.bf16.mxu1 %v1367_v3 }
  0x99   : > { %1338 = vmatpush1.bf16.msra.mxu0 %v1337_v8  ;;  %1370 = vmatpush1.bf16.msra.mxu1 %v1369_v4  ;;  %v428_v12 = vsel %vm426_vm3, %v1529_v6, %v1530_v5 }
  0x9a   : > { %v1538_v14 = vpop.permute.xlu0 %1537  ;;  %v432_v15 = vsel %vm426_vm3, %v1534_v11, %v1535_v9 }
  0x9b   : > { %v1540_v16 = vunpack.i.h.bf16 %v1538_v14  ;;  %v1539_v17 = vunpack.i.l.bf16 %v1538_v14  ;;  %v1543_v18 = vpop.permute.xlu1 %1542  ;;  %v1339_v20 = vpack.c.bf16 %v432_v15, %v428_v12 }
  0x9c   : > { %v1545_v21 = vunpack.i.h.bf16 %v1543_v18  ;;  %v1544_v22 = vunpack.i.l.bf16 %v1543_v18 }
  0x9d   : > { %1340 = vmatprep.subr.bf16.mxu0 %v1339_v20  ;;  %v391_v23 = vsel %vm387_vm2, %v1539_v17, %v1540_v16  ;;  %v390_v24 = vsel %vm387_vm2, %v1505_v38, %v1539_v17 }
  0x9e   : > { %v1891_v25 = vpack.c.bf16 %v1545_v21, %v1540_v16  ;;  %v1548_v26 = vpop.permute.xlu0 %1547  ;;  %v395_v27 = vsel %vm387_vm2, %v1544_v22, %v1545_v21  ;;  %v394_v28 = vsel %vm387_vm2, %v1510_v45, %v1544_v22  ;;  %vm1254_vm2 = vcmask 261120  }
  0x9f   : > { %v1550_v29 = vunpack.i.h.bf16 %v1548_v26  ;;  %v1549_v30 = vunpack.i.l.bf16 %v1548_v26  ;;  %v1553_v31 = vpop.permute.xlu1 %1552  ;;  %v1371_v32 = vpack.c.bf16 %v395_v27, %v391_v23  ;;  %v1373_v33 = vpack.c.bf16 %v394_v28, %v390_v24 }
  0xa0   : > { %v1555_v34 = vunpack.i.h.bf16 %v1553_v31  ;;  %v1554_v35 = vunpack.i.l.bf16 %v1553_v31 }
  0xa1   : > { %1372 = vmatprep.subr.bf16.mxu1 %v1371_v32  ;;  %v427_v36 = vsel %vm426_vm3, %v1549_v30, %v1529_v6  ;;  %v431_v37 = vsel %vm426_vm3, %v1550_v29, %v1534_v11 }
  0xa2   : > { %1374 = vmatpush1.bf16.msra.mxu1 %v1373_v33  ;;  %v1558_v38 = vpop.permute.xlu0 %1557  ;;  %v1341_v39 = vpack.c.bf16 %v431_v37, %v427_v36  ;;  %v467_v45 = vsel %vm465_vm4, %v1554_v35, %v1555_v34 }
  0xa3   : > { %v1560_v40 = vunpack.i.h.bf16 %v1558_v38  ;;  %v1559_v41 = vunpack.i.l.bf16 %v1558_v38  ;;  %v1897_v42 = vpop.permute.xlu1 %1562 }
  0xa4   : > { %1342 = vmatpush1.bf16.msra.mxu0 %v1341_v39  ;;  %v1565_v43 = vunpack.i.h.bf16 %v1897_v42  ;;  %v1564_v44 = vunpack.i.l.bf16 %v1897_v42 }
  0xa5   : > { %v471_v46 = vsel %vm465_vm4, %v1559_v41, %v1560_v40 }
  0xa6   : > { %v1903_v47 = vpop.permute.xlu0 %1567  ;;  %v1343_v48 = vpack.c.bf16 %v471_v46, %v467_v45  ;;  %v430_v54 = vsel %vm426_vm3, %v1564_v44, %v1565_v43  ;;  %v429_v56 = vsel %vm426_vm3, %v1530_v5, %v1564_v44 }
  0xa7   : > { %v1570_v49 = vunpack.i.h.bf16 %v1903_v47  ;;  %v1569_v50 = vunpack.i.l.bf16 %v1903_v47  ;;  %v1573_v51 = vpop.permute.xlu1 %1572 }
  0xa8   : > { %v1575_v52 = vunpack.i.h.bf16 %v1573_v51  ;;  %v1574_v53 = vunpack.i.l.bf16 %v1573_v51  ;;  %1344 = vmatprep.subr.bf16.mxu0 %v1343_v48 }
  0xa9   : > { %v434_v55 = vsel %vm426_vm3, %v1569_v50, %v1570_v49  ;;  %v433_v57 = vsel %vm426_vm3, %v1535_v9, %v1569_v50 }
  0xaa   : > { %v1915_v58 = vpop.permute.xlu0 %1577  ;;  %v466_v59 = vsel %vm465_vm4, %v1574_v53, %v1554_v35  ;;  %v470_v61 = vsel %vm465_vm4, %v1575_v52, %v1559_v41  ;;  %v1375_v62 = vpack.c.bf16 %v434_v55, %v430_v54  ;;  %v1377_v63 = vpack.c.bf16 %v433_v57, %v429_v56 }
  0xab   : > { %v1580_v0 = vunpack.i.h.bf16 %v1915_v58  ;;  %v1579_v1 = vunpack.i.l.bf16 %v1915_v58  ;;  %v1583_v2 = vpop.permute.xlu1 %1582  ;;  %v1345_v3 = vpack.c.bf16 %v470_v61, %v466_v59 }
  0xac   : > { %v1585_v4 = vunpack.i.h.bf16 %v1583_v2  ;;  %v1584_v6 = vunpack.i.l.bf16 %v1583_v2  ;;  %1376 = vmatprep.subr.bf16.mxu1 %v1375_v62 }
  0xad   : > { %1346 = vmatpush1.bf16.msra.mxu0 %v1345_v3  ;;  %1378 = vmatpush1.bf16.msra.mxu1 %v1377_v63  ;;  %v506_v5 = vsel %vm504_vm5, %v1579_v1, %v1580_v0 }
  0xae   : > { %v1922_v7 = vpop.permute.xlu0 %1587  ;;  %v510_v8 = vsel %vm504_vm5, %v1584_v6, %v1585_v4 }
  0xaf   : > { %v1590_v9 = vunpack.i.h.bf16 %v1922_v7  ;;  %v1589_v11 = vunpack.i.l.bf16 %v1922_v7  ;;  %v1927_v12 = vpop.permute.xlu1 %1592  ;;  %v1347_v14 = vpack.c.bf16 %v510_v8, %v506_v5 }
  0xb0   : > { %v1595_v15 = vunpack.i.h.bf16 %v1927_v12  ;;  %v1594_v16 = vunpack.i.l.bf16 %v1927_v12 }
  0xb1   : > { %1348 = vmatprep.subr.bf16.mxu0 %v1347_v14  ;;  %v469_v17 = vsel %vm465_vm4, %v1589_v11, %v1590_v9  ;;  %v468_v18 = vsel %vm465_vm4, %v1555_v34, %v1589_v11 }
  0xb2   : > { %v1598_v20 = vpop.permute.xlu0 %1597  ;;  %v473_v21 = vsel %vm465_vm4, %v1594_v16, %v1595_v15  ;;  %v472_v22 = vsel %vm465_vm4, %v1560_v40, %v1594_v16 }
  0xb3   : > { %v1600_v23 = vunpack.i.h.bf16 %v1598_v20  ;;  %v1599_v24 = vunpack.i.l.bf16 %v1598_v20  ;;  %v1603_v26 = vpop.permute.xlu1 %1602  ;;  %v1379_v27 = vpack.c.bf16 %v473_v21, %v469_v17  ;;  %v1381_v28 = vpack.c.bf16 %v472_v22, %v468_v18 }
  0xb4   : > { %v1605_v29 = vunpack.i.h.bf16 %v1603_v26  ;;  %v1604_v30 = vunpack.i.l.bf16 %v1603_v26 }
  0xb5   : > { %1380 = vmatprep.subr.bf16.mxu1 %v1379_v27  ;;  %v505_v31 = vsel %vm504_vm5, %v1599_v24, %v1579_v1  ;;  %v509_v32 = vsel %vm504_vm5, %v1600_v23, %v1584_v6 }
  0xb6   : > { %1382 = vmatpush1.bf16.msra.mxu1 %v1381_v28  ;;  %v1608_v33 = vpop.permute.xlu0 %1607  ;;  %v1349_v34 = vpack.c.bf16 %v509_v32, %v505_v31  ;;  %v551_v40 = vsel %vm549_vm6, %v1604_v30, %v1605_v29 }
  0xb7   : > { %v1610_v35 = vunpack.i.h.bf16 %v1608_v33  ;;  %v1609_v36 = vunpack.i.l.bf16 %v1608_v33  ;;  %v1941_v37 = vpop.permute.xlu1 %1612 }
  0xb8   : > { %1350 = vmatpush1.bf16.msra.mxu0 %v1349_v34  ;;  %v1615_v38 = vunpack.i.h.bf16 %v1941_v37  ;;  %v1614_v39 = vunpack.i.l.bf16 %v1941_v37 }
  0xb9   : > { %v556_v41 = vsel %vm549_vm6, %v1609_v36, %v1610_v35 }
  0xba   : > { %v1947_v44 = vpop.permute.xlu0 %1617  ;;  %v1351_v45 = vpack.c.bf16 %v556_v41, %v551_v40  ;;  %v508_v53 = vsel %vm504_vm5, %v1614_v39, %v1615_v38  ;;  %v507_v55 = vsel %vm504_vm5, %v1580_v0, %v1614_v39 }
  0xbb   : > { %v1620_v46 = vunpack.i.h.bf16 %v1947_v44  ;;  %v1619_v48 = vunpack.i.l.bf16 %v1947_v44  ;;  %v1623_v50 = vpop.permute.xlu1 %1622 }
  0xbc   : > { %v1625_v51 = vunpack.i.h.bf16 %v1623_v50  ;;  %v1624_v52 = vunpack.i.l.bf16 %v1623_v50  ;;  %1352 = vmatprep.subr.bf16.mxu0 %v1351_v45 }
  0xbd   : > { %v512_v54 = vsel %vm504_vm5, %v1619_v48, %v1620_v46  ;;  %v511_v56 = vsel %vm504_vm5, %v1585_v4, %v1619_v48 }
  0xbe   : > { %v1959_v57 = vpop.permute.xlu0 %1627  ;;  %v550_v58 = vsel %vm549_vm6, %v1624_v52, %v1604_v30  ;;  %v555_v59 = vsel %vm549_vm6, %v1625_v51, %v1609_v36  ;;  %v1383_v61 = vpack.c.bf16 %v512_v54, %v508_v53  ;;  %v1385_v62 = vpack.c.bf16 %v511_v56, %v507_v55 }
  0xbf   : > { %v1630_v63 = vunpack.i.h.bf16 %v1959_v57  ;;  %v1629_v1 = vunpack.i.l.bf16 %v1959_v57  ;;  %v1633_v2 = vpop.permute.xlu1 %1632  ;;  %v1353_v3 = vpack.c.bf16 %v555_v59, %v550_v58 }
  0xc0   : > { %v1635_v6 = vunpack.i.h.bf16 %v1633_v2  ;;  %v1634_v5 = vunpack.i.l.bf16 %v1633_v2  ;;  %1384 = vmatprep.subr.bf16.mxu1 %v1383_v61 }
  0xc1   : > { %1354 = vmatpush1.bf16.msra.mxu0 %v1353_v3  ;;  %1386 = vmatpush1.bf16.msra.mxu1 %v1385_v62  ;;  %v596_v0 = vsel %vm594_vm7, %v1629_v1, %v1630_v63 }
  0xc2   : > { %v1966_v4 = vpop.permute.xlu0 %1637  ;;  %v601_v8 = vsel %vm594_vm7, %v1634_v5, %v1635_v6 }
  0xc3   : > { %v1640_v11 = vunpack.i.h.bf16 %v1966_v4  ;;  %v1639_v14 = vunpack.i.l.bf16 %v1966_v4  ;;  %v1971_v16 = vpop.permute.xlu1 %1642  ;;  %v1355_v17 = vpack.c.bf16 %v601_v8, %v596_v0 }
  0xc4   : > { %v1645_v18 = vunpack.i.h.bf16 %v1971_v16  ;;  %v1644_v20 = vunpack.i.l.bf16 %v1971_v16  ;;  %v907_v16 = vlaneseq }
  0xc5   : > { %1356 = vmatprep.subr.bf16.mxu0 %v1355_v17  ;;  %v553_v21 = vsel %vm549_vm6, %v1639_v14, %v1640_v11  ;;  %v552_v22 = vsel %vm549_vm6, %v1605_v29, %v1639_v14 }
  0xc6   : > { %v1648_v23 = vpop.permute.xlu0 %1647  ;;  %v558_v24 = vsel %vm549_vm6, %v1644_v20, %v1645_v18  ;;  %v557_v26 = vsel %vm549_vm6, %v1610_v35, %v1644_v20 }
  0xc7   : > { %v1650_v27 = vunpack.i.h.bf16 %v1648_v23  ;;  %v1649_v28 = vunpack.i.l.bf16 %v1648_v23  ;;  %v1653_v30 = vpop.permute.xlu1 %1652  ;;  %v1387_v31 = vpack.c.bf16 %v558_v24, %v553_v21  ;;  %v1389_v32 = vpack.c.bf16 %v557_v26, %v552_v22 }
  0xc8   : > { %v1655_v33 = vunpack.i.h.bf16 %v1653_v30  ;;  %v1654_v34 = vunpack.i.l.bf16 %v1653_v30  ;;  %v1400_v26 = vpack.c.bf16 %v1842_v13, %v1837_v10  ;;  %v1409_v10 = vpack.c.bf16 %v1570_v49, %v1565_v43 }
  0xc9   : > { %1388 = vmatprep.subr.bf16.mxu1 %v1387_v31  ;;  %v595_v36 = vsel %vm594_vm7, %v1649_v28, %v1629_v1  ;;  %v600_v39 = vsel %vm594_vm7, %v1650_v27, %v1634_v5  ;;  %v1755_v28 = vmov 0.0|0.0  }
  0xca   : > { %1390 = vmatpush1.bf16.msra.mxu1 %v1389_v32  ;;  %v1658_v29 = vpop.permute.xlu0 %1657  ;;  %v1357_v40 = vpack.c.bf16 %v600_v39, %v595_v36  ;;  %v641_v51 = vsel %vm639_vm8, %v1654_v34, %v1655_v33 }
  0xcb   : > { %v1660_v41 = vunpack.i.h.bf16 %v1658_v29  ;;  %v1659_v45 = vunpack.i.l.bf16 %v1658_v29  ;;  %v1985_v48 = vpop.permute.xlu1 %1662 }
  0xcc   : > { %1358 = vmatpush1.bf16.msra.mxu0 %v1357_v40  ;;  %v1665_v35 = vunpack.i.h.bf16 %v1985_v48  ;;  %v1664_v50 = vunpack.i.l.bf16 %v1985_v48 }
  0xcd   : > { %v646_v52 = vsel %vm639_vm8, %v1659_v45, %v1660_v41 }
  0xce   : > { %v1991_v53 = vpop.permute.xlu0 %1667  ;;  %v1359_v54 = vpack.c.bf16 %v646_v52, %v641_v51  ;;  %v598_v61 = vsel %vm594_vm7, %v1664_v50, %v1665_v35  ;;  %v597_v1 = vsel %vm594_vm7, %v1630_v63, %v1664_v50  ;;  %v660_v63 = vld [vmem:[%s2185_s1] sm:$0xff] }
  0xcf   : > { %v1670_v55 = vunpack.i.h.bf16 %v1991_v53  ;;  %v1669_v56 = vunpack.i.l.bf16 %v1991_v53  ;;  %v1673_v57 = vpop.permute.xlu1 %1672 }
  0xd0   : > { %v1675_v58 = vunpack.i.h.bf16 %v1673_v57  ;;  %v1674_v59 = vunpack.i.l.bf16 %v1673_v57  ;;  %1360 = vmatprep.subr.bf16.mxu0 %v1359_v54 }
  0xd1   : > { %v603_v62 = vsel %vm594_vm7, %v1669_v56, %v1670_v55  ;;  %v602_v2 = vsel %vm594_vm7, %v1635_v6, %v1669_v56 }
  0xd2   : > { %v2003_v3 = vpop.permute.xlu0 %1677  ;;  %v640_v5 = vsel %vm639_vm8, %v1674_v59, %v1654_v34  ;;  %v645_v0 = vsel %vm639_vm8, %v1675_v58, %v1659_v45  ;;  %v1391_v8 = vpack.c.bf16 %v603_v62, %v598_v61  ;;  %v1393_v14 = vpack.c.bf16 %v602_v2, %v597_v1 }
  0xd3   : > { %v1680_v17 = vunpack.i.h.bf16 %v2003_v3  ;;  %v1679_v20 = vunpack.i.l.bf16 %v2003_v3  ;;  %v1683_v21 = vpop.permute.xlu1 %1682  ;;  %v1361_v22 = vpack.c.bf16 %v645_v0, %v640_v5 }
  0xd4   : > { %v1685_v23 = vunpack.i.h.bf16 %v1683_v21  ;;  %v1684_v24 = vunpack.i.l.bf16 %v1683_v21  ;;  %1392 = vmatprep.subr.bf16.mxu1 %v1391_v8 }
  0xd5   : > { %1362 = vmatpush1.bf16.msra.mxu0 %v1361_v22  ;;  %1394 = vmatpush1.bf16.msra.mxu1 %v1393_v14  ;;  %v643_v6 = vsel %vm639_vm8, %v1679_v20, %v1680_v17  ;;  %v642_v27 = vsel %vm639_vm8, %v1655_v33, %v1679_v20 }
  0xd6   : > { %1399 = vmatprep.subr.bf16.mxu0 %v1755_v28  ;;  %v648_v30 = vsel %vm639_vm8, %v1684_v24, %v1685_v23  ;;  %v647_v31 = vsel %vm639_vm8, %v1660_v41, %v1684_v24  ;;  %v1688_v13 = vpop.permute.xlu0 %1687  ;;  %v905_v41 = vld [vmem:[%s2191_s7] sm:$0x1f] }
  0xd7   : > { %v1395_v32 = vpack.c.bf16 %v648_v30, %v643_v6  ;;  %v1397_v34 = vpack.c.bf16 %v647_v31, %v642_v27  ;;  %v1690_v33 = vunpack.i.h.bf16 %v1688_v13  ;;  %v1689_v36 = vunpack.i.l.bf16 %v1688_v13 }
  0xd8   : > { %731 = vmatmul.mubr.f32.vlgmr.msra.gmra.mrb[0].mxu0 %v660_v63  ;;  %v1764_v6 = vmov 0.0  }
  0xd9   : > { %1396 = vmatprep.subr.bf16.mxu1 %v1395_v32  ;;  %1401 = vmatpush1.bf16.msra.mxu0 %v1400_v26  ;;  %v554_v42 = vsel %vm549_vm6, %v1640_v11, %v1689_v36  ;;  %v559_v43 = vsel %vm549_vm6, %v1645_v18, %v1690_v33  ;;  %v2048_v18 = vshrl.u32 %v907_v16, 7  ;;  %v1227_v33 = vld [vmem:[%s2189_s5] sm:$0xff] }
  0xda   : > { %1398 = vmatpush1.bf16.msra.mxu1 %v1397_v34  ;;  %1402 = vmatprep.subr.bf16.mxu0 %v1755_v28  ;;  %v1698_v7 = vpop.permute.xlu0 %1697 }
  0xdb   : > { %1321 = vmatprep.mubr.msk.f32.mxu0 %vm662_vm0, %v1854_v19  ;;  %v1412_v19 = vpack.c.bf16 %v1595_v15, %v1590_v9  ;;  %v1418_v9 = vpack.c.bf16 %v559_v43, %v554_v42  ;;  %v1700_v37 = vunpack.i.h.bf16 %v1698_v7  ;;  %v909_v29 = vsub.s32 0, %v2048_v18 }
  0xdc   : > { %v913_v45 = vsub.s32 1, %v2048_v18  ;;  %v917_v56 = vsub.s32 2, %v2048_v18  ;;  %v921_v59 = vsub.s32 3, %v2048_v18  ;;  %v925_v26 = vsub.s32 4, %v2048_v18 }
  0xdd   : > { %802 = vmatmul.mubr.f32.vlgmr.msra.gmra.mrb[0].mxu1 %v660_v63  ;;  %1404 = vmatpush1.bf16.msra.mxu0 %v1876_v60  ;;  %v1693_v60 = vpop.permute.xlu1 %1692  ;;  %v649_v4 = vsel %vm639_vm8, %v1685_v23, %v1700_v37  ;;  %v910_v52 = vrot.slane %v905_v41, %v909_v29  ;;  %vm1057_vm0 = vcmask 793600  }
  0xde   : > { %1405 = vmatprep.subr.bf16.mxu0 %v1755_v28  ;;  %v1695_v47 = vunpack.i.h.bf16 %v1693_v60  ;;  %v1694_v49 = vunpack.i.l.bf16 %v1693_v60  ;;  %v914_v54 = vrot.slane %v905_v41, %v913_v45  ;;  %v918_v8 = vrot.slane %v905_v41, %v917_v56  ;;  %1149 = vmatprep.mubr.f32.mxu1 %v1764_v6 }
  0xdf   : > { %v926_v32 = vrot.slane %v905_v41, %v925_v26 }
  0xe0   : > { %v604_v12 = vsel %vm594_vm7, %v1670_v55, %v1695_v47  ;;  %v599_v15 = vsel %vm594_vm7, %v1665_v35, %v1694_v49 }
  0xe1   : > { %1407 = vmatpush1.bf16.msra.mxu0 %v1891_v25  ;;  %v1415_v25 = vpack.c.bf16 %v1620_v46, %v1615_v38  ;;  %v1699_v38 = vunpack.i.l.bf16 %v1698_v7  ;;  %v1421_v44 = vpack.c.bf16 %v604_v12, %v599_v15 }
  0xe2   : > { %1408 = vmatprep.subr.bf16.mxu0 %v1755_v28 }
  0xe3   : > { %v644_v46 = vsel %vm639_vm8, %v1680_v17, %v1699_v38  ;;  %v922_v17 = vrot.slane %v905_v41, %v921_v59 }
  0xe4   : > { %v1424_v11 = vpack.c.bf16 %v649_v4, %v644_v46 }
  0xe5   : > { %1410 = vmatpush1.bf16.msra.mxu0 %v1409_v10 }
  0xe6   : > { %1411 = vmatprep.subr.bf16.mxu0 %v1755_v28 }
  0xe8   : > { %v882_v39 = vpop.permute.xlu1 %881 }
  0xe9   : > { %1413 = vmatpush1.bf16.msra.mxu0 %v1412_v19  ;;  %v1237_v19 = vld [vmem:[%s2190_s6] sm:$0xff] }
  0xea   : > { %1414 = vmatprep.subr.bf16.mxu0 %v1755_v28 }
  0xeb   : > { %v893_v48 = vpop.permute.xlu0 %892 }
  0xed   : > { %1416 = vmatpush1.bf16.msra.mxu0 %v1415_v25 }
  0xee   : > { %1417 = vmatprep.subr.bf16.mxu0 %v1755_v28 }
  0xf1   : > { %1419 = vmatpush1.bf16.msra.mxu0 %v1418_v9 }
  0xf2   : > { %1420 = vmatprep.subr.bf16.mxu0 %v1755_v28 }
  0xf5   : > { %1422 = vmatpush1.bf16.msra.mxu0 %v1421_v44 }
  0xf6   : > { %1423 = vmatprep.subr.bf16.mxu0 %v1755_v28 }
  0xf9   : > { %1425 = vmatpush1.bf16.msra.mxu0 %v1424_v11 }
  0xfc   : > { %873 = vmatmul.mubr.f32.vlgmr.msra.gmra.mrb[2].mxu0 %v660_v63 }
 0x1ab   : > { %v732_v40 = vpop.f32.mrb[0].mxu0 }
 0x1ac   : > { %v884_v35 = vmul.f32 %v882_v39, %v732_v40  ;;  %v734_v50 = vpop.f32.mrb[1].mxu0 }
 0x1ad   : > { %v885_v51 = vmul.f32 %v882_v39, %v734_v50 }
 0x1ae   : > { %v895_v53 = vadd.f32 %v893_v48, %v884_v35 }
 0x1af   : > { %v896_v55 = vadd.f32 %v893_v48, %v885_v51 }
 0x1b0   : > { %v900_v57 = vmax.f32 %v895_v53, 0.0  ;;  %v803_v58 = vpop.f32.mrb[0].mxu1 }
 0x1b1   : > { %v901_v61 = vmax.f32 %v896_v55, 0.0  ;;  %v886_v62 = vmul.f32 %v882_v39, %v803_v58  ;;  %v805_v1 = vpop.f32.mrb[1].mxu1 }
 0x1b2   : > { %v2057_v2 = vmul.f32 %v910_v52, %v900_v57  ;;  %v887_v3 = vmul.f32 %v882_v39, %v805_v1 }
 0x1b3   : > { %v2059_v5 = vmul.f32 %v914_v54, %v901_v61  ;;  %v897_v0 = vadd.f32 %v893_v48, %v886_v62 }
 0x1b4   : > { %v898_v14 = vadd.f32 %v893_v48, %v887_v3  ;;  %968 = vrot.lane.b32.xlu0 %v2057_v2, %s1756_s9  ;;  %952 = vrot.lane.b32.xlu1 %v2057_v2, %s1757_s10 }
 0x1b5   : > { %v902_v20 = vmax.f32 %v897_v0, 0.0 }
 0x1b6   : > { %v903_v21 = vmax.f32 %v898_v14, 0.0 }
 0x1b7   : > { %v2065_v22 = vmul.f32 %v918_v8, %v902_v20 }
 0x1b8   : > { %v2067_v23 = vmul.f32 %v922_v17, %v903_v21  ;;  %1000 = vrot.lane.b32.xlu0 %v2057_v2, %s1758_s11  ;;  %984 = vrot.lane.b32.xlu1 %v2057_v2, %s1759_s12 }
 0x1b9   : > { %v1708_v24 = vpack.i.bf16 %v2065_v22, %v2059_v5 }
 0x1ba   : > { %v1728_v63 = vpack.i.bf16 %v2067_v23, %v2065_v22 }
 0x1bc   : > { %1016 = vrot.lane.b32.xlu1 %v2057_v2, %s1760_s13  ;;  %1709 = vrot.lane.b32.xlu0 %v1708_v24, %s1756_s9 }
 0x1c0   : > { %1719 = vrot.lane.b32.xlu0 %v1708_v24, %s1758_s11  ;;  %1704 = vrot.lane.b32.xlu1 %v1708_v24, %s1757_s10 }
 0x1c4   : > { %1729 = vrot.lane.b32.xlu0 %v1728_v63, %s1761_s14  ;;  %1714 = vrot.lane.b32.xlu1 %v1708_v24, %s1759_s12 }
 0x1c8   : > { %1033 = vrot.lane.b32.xlu0 %v2059_v5, %s1761_s14  ;;  %1724 = vrot.lane.b32.xlu1 %v1708_v24, %s1760_s13 }
 0x1cc   : > { %1067 = vrot.lane.b32.xlu0 %v2065_v22, %s1762_s15  ;;  %1734 = vrot.lane.b32.xlu1 %v1728_v63, %s1763_s16 }
 0x1cf   : > { %v874_v27 = vpop.f32.mrb[2].mxu0 }
 0x1d0   : > { %v888_v28 = vmul.f32 %v882_v39, %v874_v27  ;;  %958 = vrot.lane.b32.xlu0 %v2067_v23, %s1757_s10  ;;  %1049 = vrot.lane.b32.xlu1 %v2059_v5, %s1763_s16  ;;  %v876_v30 = vpop.f32.mrb[3].mxu0 }
 0x1d2   : > { %v899_v31 = vadd.f32 %v893_v48, %v888_v28 }
 0x1d4   : > { %v904_v34 = vmax.f32 %v899_v31, 0.0  ;;  %974 = vrot.lane.b32.xlu0 %v2067_v23, %s1756_s9  ;;  %1069 = vrot.lane.b32.xlu1 %v2067_v23, %s1762_s15 }
 0x1d6   : > { %v936_v10 = vmul.f32 %v926_v32, %v904_v34 }
 0x1d8   : > { %942 = vst.msk [vmem:[#allocation2 + $0x20] sm:$0xff] %vm941_vm9, %v936_v10  ;;  %1006 = vrot.lane.b32.xlu0 %v2067_v23, %s1758_s11  ;;  %1065 = vrot.lane.b32.xlu1 %v2059_v5, %s1762_s15  ;;  %v1081_v10 = vld [vmem:[%s2188_s4] sm:$0xff] }
 0x1dc   : > { %990 = vrot.lane.b32.xlu1 %v2067_v23, %s1759_s12 }
 0x1df   : > { %v947_v13 = vld [vmem:[#allocation2 + $0x20] sm:$0xff] }
 0x1e0   : > { %1039 = vrot.lane.b32.xlu0 %v947_v13, %s1761_s14  ;;  %1022 = vrot.lane.b32.xlu1 %v2067_v23, %s1760_s13 }
 0x1e4   : > { %1071 = vrot.lane.b32.xlu0 %v947_v13, %s1762_s15  ;;  %1055 = vrot.lane.b32.xlu1 %v947_v13, %s1763_s16 }
 0x1e8   : > { %1240 = vperm.xlu0 %1702, %v1237_v19   ;;  %1230 = vperm.xlu1 %1701, %v1227_v33  }
 0x226   : > { %v969_v36 = vpop.permute.xlu0 %968  ;;  %v953_v60 = vpop.permute.xlu1 %952 }
 0x22a   : > { %v1001_v25 = vpop.permute.xlu0 %1000  ;;  %v985_v42 = vpop.permute.xlu1 %984 }
 0x22e   : > { %v1017_v43 = vpop.permute.xlu1 %1016  ;;  %v2107_v47 = vpop.permute.xlu0 %1709 }
 0x22f   : > { %v1712_v15 = vunpack.i.h.bf16 %v2107_v47  ;;  %v1711_v37 = vunpack.i.l.bf16 %v2107_v47 }
 0x231   : > { %v977_v41 = vsel %vm976_vm11, %v969_v36, %v1711_v37  ;;  %v978_v48 = vsel %vm976_vm11, %v1711_v37, %v1712_v15 }
 0x232   : > { %v2109_v49 = vpop.permute.xlu0 %1719  ;;  %v2111_v7 = vpop.permute.xlu1 %1704 }
 0x233   : > { %v1707_v9 = vunpack.i.h.bf16 %v2111_v7  ;;  %v1706_v12 = vunpack.i.l.bf16 %v2111_v7  ;;  %v1722_v29 = vunpack.i.h.bf16 %v2109_v49  ;;  %v1721_v40 = vunpack.i.l.bf16 %v2109_v49 }
 0x235   : > { %v961_v38 = vsel %vm960_vm10, %v953_v60, %v1706_v12  ;;  %v962_v44 = vsel %vm960_vm10, %v1706_v12, %v1707_v9  ;;  %v1009_v56 = vsel %vm1008_vm13, %v1001_v25, %v1721_v40  ;;  %v1010_v57 = vsel %vm1008_vm13, %v1721_v40, %v1722_v29 }
 0x236   : > { %v1428_v46 = vpack.c.bf16 %v961_v38, %v2057_v2  ;;  %v2122_v4 = vpop.permute.xlu0 %1729  ;;  %v2124_v11 = vpop.permute.xlu1 %1714  ;;  %v1426_v16 = vpack.c.bf16 %v962_v44, %v2059_v5 }
 0x237   : > { %v1717_v18 = vunpack.i.h.bf16 %v2124_v11  ;;  %v1716_v39 = vunpack.i.l.bf16 %v2124_v11  ;;  %v1732_v58 = vunpack.i.h.bf16 %v2122_v4  ;;  %v1731_v59 = vunpack.i.l.bf16 %v2122_v4 }
 0x238   : > { %1427 = vmatprep.subr.bf16.mxu1 %v1426_v16 }
 0x239   : > { %v993_v45 = vsel %vm992_vm12, %v985_v42, %v1716_v39  ;;  %1429 = vmatpush1.bf16.msra.mxu1 %v1428_v46  ;;  %v994_v35 = vsel %vm992_vm12, %v1716_v39, %v1717_v18  ;;  %v1043_v14 = vsel %vm1041_vm15, %v1731_v59, %v1732_v58 }
 0x23a   : > { %v1432_v50 = vpack.c.bf16 %v993_v45, %v977_v41  ;;  %v1034_v51 = vpop.permute.xlu0 %1033  ;;  %v1725_v52 = vpop.permute.xlu1 %1724  ;;  %v1430_v53 = vpack.c.bf16 %v994_v35, %v978_v48 }
 0x23b   : > { %v1727_v54 = vunpack.i.h.bf16 %v1725_v52  ;;  %v1726_v55 = vunpack.i.l.bf16 %v1725_v52  ;;  %v1042_v24 = vsel %vm1041_vm15, %v1034_v51, %v1731_v59 }
 0x23c   : > { %1431 = vmatprep.subr.bf16.mxu1 %v1430_v53 }
 0x23d   : > { %v1025_v61 = vsel %vm1024_vm14, %v1017_v43, %v1726_v55  ;;  %1433 = vmatpush1.bf16.msra.mxu1 %v1432_v50  ;;  %v1026_v62 = vsel %vm1024_vm14, %v1726_v55, %v1727_v54 }
 0x23e   : > { %v1436_v1 = vpack.c.bf16 %v1025_v61, %v1009_v56  ;;  %v1068_v2 = vpop.permute.xlu0 %1067  ;;  %v1735_v3 = vpop.permute.xlu1 %1734  ;;  %v1434_v5 = vpack.c.bf16 %v1026_v62, %v1010_v57 }
 0x23f   : > { %v1737_v0 = vunpack.i.h.bf16 %v1735_v3  ;;  %v1736_v8 = vunpack.i.l.bf16 %v1735_v3 }
 0x240   : > { %1435 = vmatprep.subr.bf16.mxu1 %v1434_v5 }
 0x241   : > { %1437 = vmatpush1.bf16.msra.mxu1 %v1436_v1  ;;  %v1059_v17 = vsel %vm1057_vm0, %v1736_v8, %v1737_v0 }
 0x242   : > { %v1050_v20 = vpop.permute.xlu1 %1049  ;;  %v1438_v21 = vpack.c.bf16 %v1059_v17, %v1043_v14  ;;  %v959_v26 = vpop.permute.xlu0 %958 }
 0x243   : > { %v1058_v63 = vsel %vm1057_vm0, %v1050_v20, %v1736_v8  ;;  %v963_v31 = vsel %vm960_vm10, %v1707_v9, %v959_v26  ;;  %v1442_v13 = vpack.c.bf16 %v959_v26, %v2067_v23 }
 0x244   : > { %v1440_v27 = vpack.c.bf16 %v1058_v63, %v1042_v24  ;;  %1439 = vmatprep.subr.bf16.mxu1 %v1438_v21  ;;  %v1444_v33 = vpack.c.bf16 %v963_v31, %v2065_v22 }
 0x246   : > { %v1070_v28 = vpop.permute.xlu1 %1069  ;;  %1441 = vmatpush1.bf16.msra.mxu1 %v1440_v27  ;;  %v975_v32 = vpop.permute.xlu0 %974 }
 0x247   : > { %v1075_v30 = vsel %vm1073_vm1, %v1068_v2, %v1070_v28  ;;  %v979_v60 = vsel %vm976_vm11, %v1712_v15, %v975_v32 }
 0x248   : > { %1101 = vmatprep.subr.mxu1 %v1075_v30 }
 0x24a   : > { %v1066_v34 = vpop.permute.xlu1 %1065  ;;  %v1007_v42 = vpop.permute.xlu0 %1006 }
 0x24b   : > { %v1074_v19 = vsel %vm1073_vm1, %v1066_v34, %v1068_v2  ;;  %v1011_v7 = vsel %vm1008_vm13, %v1722_v29, %v1007_v42 }
 0x24c   : > { %1102 = vmatpush1.msra.mxu1 %v1074_v19 }
 0x24d   : > { %1322 = vmatmul.mubr.msk.f32.vlgmr.msra.gmra.mrb[2].mxu1 %vm504_vm5, %v1081_v10  ;;  %1443 = vmatprep.subr.bf16.mxu1 %v1442_v13 }
 0x24e   : > { %v991_v36 = vpop.permute.xlu1 %990  ;;  %1445 = vmatpush1.bf16.msra.mxu1 %v1444_v33  ;;  %1220 = vmatprep.mubr.f32.mxu1 %v1764_v6 }
 0x24f   : > { %v995_v23 = vsel %vm992_vm12, %v1717_v18, %v991_v36  ;;  %v1446_v25 = vpack.c.bf16 %v991_v36, %v975_v32 }
 0x250   : > { %v1448_v43 = vpack.c.bf16 %v995_v23, %v979_v60 }
 0x251   : > { %1447 = vmatprep.subr.bf16.mxu1 %v1446_v25 }
 0x252   : > { %v1023_v22 = vpop.permute.xlu1 %1022  ;;  %1449 = vmatpush1.bf16.msra.mxu1 %v1448_v43  ;;  %v1040_v47 = vpop.permute.xlu0 %1039 }
 0x253   : > { %v1027_v6 = vsel %vm1024_vm14, %v1727_v54, %v1023_v22  ;;  %v1450_v9 = vpack.c.bf16 %v1023_v22, %v1007_v42  ;;  %v1044_v37 = vsel %vm1041_vm15, %v1732_v58, %v1040_v47 }
 0x254   : > { %v1452_v12 = vpack.c.bf16 %v1027_v6, %v1011_v7 }
 0x255   : > { %1451 = vmatprep.subr.bf16.mxu1 %v1450_v9 }
 0x256   : > { %1453 = vmatpush1.bf16.msra.mxu1 %v1452_v12  ;;  %v1056_v15 = vpop.permute.xlu1 %1055  ;;  %v1072_v4 = vpop.permute.xlu0 %1071 }
 0x257   : > { %v1060_v38 = vsel %vm1057_vm0, %v1737_v0, %v1056_v15  ;;  %v1454_v44 = vpack.c.bf16 %v1056_v15, %v1040_v47  ;;  %v1076_v49 = vsel %vm1073_vm1, %v1070_v28, %v1072_v4 }
 0x258   : > { %v1456_v46 = vpack.c.bf16 %v1060_v38, %v1044_v37 }
 0x259   : > { %1455 = vmatprep.subr.bf16.mxu1 %v1454_v44 }
 0x25a   : > { %1457 = vmatpush1.bf16.msra.mxu1 %v1456_v46 }
 0x25b   : > { %1172 = vmatprep.subr.mxu1 %v1072_v4 }
 0x25e   : > { %1173 = vmatpush1.msra.mxu1 %v1076_v49 }
 0x25f   : > { %1323 = vmatmul.mubr.msk.f32.vlgmr.msra.gmra.mrb[4].mxu1 %vm504_vm5, %v1081_v10 }
 0x267   : > { %v1231_v11 = vpop.permute.xlu1 %1230  ;;  %v1241_v29 = vpop.permute.xlu0 %1240 }
 0x320   : > { %v1151_v16 = vpop.f32.mrb[2].mxu1 }
 0x321   : > { %v1233_v18 = vmul.f32 %v1231_v11, %v1151_v16  ;;  %v1153_v39 = vpop.f32.mrb[3].mxu1 }
 0x322   : > { %v1234_v40 = vmul.f32 %v1231_v11, %v1153_v39 }
 0x323   : > { %v1243_v41 = vadd.f32 %v1241_v29, %v1233_v18 }
 0x324   : > { %v1244_v45 = vadd.f32 %v1241_v29, %v1234_v40 }
 0x325   : > { %v1247_v48 = vmax.f32 %v1243_v41, 0.0 }
 0x326   : > { %v1248_v35 = vmax.f32 %v1244_v45, 0.0 }
 0x327   : > { %1251 = vst [vmem:[%s305_s26] sm:$0xff] %v1247_v48 }
 0x328   : > { %1252 = vst [vmem:[%s305_s26 + $0x8] sm:$0xff] %v1248_v35 }
 0x332   : > { %v1222_v50 = vpop.f32.mrb[4].mxu1 }
 0x333   : > { %v1235_v51 = vmul.f32 %v1231_v11, %v1222_v50  ;;  %v1224_v52 = vpop.f32.mrb[5].mxu1 }
 0x334   : > { %v1236_v53 = vmul.f32 %v1231_v11, %v1224_v52 }
 0x335   : > { %v1245_v54 = vadd.f32 %v1241_v29, %v1235_v51 }
 0x336   : > { %v1246_v55 = vadd.f32 %v1241_v29, %v1236_v53 }
 0x337   : > { %v1249_v56 = vmax.f32 %v1245_v54, 0.0 }
 0x338   : > { %v1250_v57 = vmax.f32 %v1246_v55, 0.0 }
 0x339   : > { %1253 = vst [vmem:[%s305_s26 + $0x10] sm:$0xff] %v1249_v56 }
 0x33a   : > { %1255 = vst.msk [vmem:[%s305_s26 + $0x18] sm:$0xff] %vm1254_vm2, %v1250_v57 }
 0x33b PF: > { %s18_s27 = sadd.s32 1, %s1744_s27  }
 0x33c   : > { %p15_p4 = scmp.ge.s32.totalorder %s18_s27, 4  }
 0x33e   :  { %17 = sbr.rel (!%p15_p4) target bundleno = 1 (0x1), region = 82 }

</bundles_post_ra>
